<compile_context>
chip_gen: v5e
topology: v5e:2x2
jax: 0.10.0
libtpu: 0.0.40
codegen_flags: <defaults>
</compile_context>

<pallas_src>
import functools
import math

import jax
import jax.numpy as jnp
from jax.experimental import pallas as pl
from jax.experimental.pallas import tpu as pltpu

_QUANT_BITS = 8
_LEVELS = (1 << _QUANT_BITS) - 1

_IN_LO, _IN_HI = -2.5, 2.5      # self.In buffer
_L1_LO, _L1_HI = 0.0, 2.0       # self.layer1 buffer
_W_LO, _W_HI = -1.0, 1.0        # assumed default Quantize range for the mask

_IN_SCALE = (_IN_HI - _IN_LO) / _LEVELS
_IN_INV = 1.0 / _IN_SCALE
_L1_SCALE = (_L1_HI - _L1_LO) / _LEVELS
_L1_INV = 1.0 / _L1_SCALE


def _quantize_codes(x, lo, hi, inv_scale):
    """Integer quantization codes in [0, 255] (exactly representable in bf16)."""
    return jnp.round((jnp.clip(x, lo, hi) - lo) * inv_scale)


def _quantize(x, lo, hi):
    """Uniform fake-quantization: clamp to [lo, hi], snap to 2**bits levels."""
    scale = (hi - lo) / _LEVELS
    return _quantize_codes(x, lo, hi, 1.0 / scale) * scale + lo


def _q02(x):
    """Quantize(x, 0, 2) specialized for lo == 0 (bit-identical, fewer VALU ops)."""
    return jnp.round(jnp.clip(x, _L1_LO, _L1_HI) * _L1_INV) * _L1_SCALE


# ---------------------------------------------------------------------------
# Kernels
# ---------------------------------------------------------------------------

def _dfr_fold_kernel(codes_ref, sel_ref, qmask_ref, prev_ref, out_ref):
    """Folded (n_in == 1) path: `fold` consecutive rows share one 128-lane row.

    codes_ref: (TR, K)   exact integer x-quantization codes (zero-padded K)
    sel_ref:   (K, 128)  0/1 selector, sel[g, l] = (l // h == g)
    qmask_ref: (1, 128)  pre-quantized mask, tiled `fold` times
    prev_ref:  (TR, 128)
    out_ref:   (TR, 128)
    """
    # Expansion on the idle MXU; exact at any precision (integers x {0,1}).
    wide = jnp.dot(codes_ref[...], sel_ref[...],
                   preferred_element_type=jnp.float32)
    x_q = wide * _IN_SCALE + _IN_LO               # dequant, same fp ops as ref
    vec = _q02(x_q * qmask_ref[...])              # matmul + act1 + Quantize(0,2)
    out_ref[...] = _q02(vec + prev_ref[...])      # act1 + Quantize(0,2)


def _dfr_general_kernel(xq_ref, qmask_ref, prev_ref, out_ref, *, n_in):
    """General fallback path (fold == 1): xq_ref (TR, n_in), qmask (n_in, H)."""
    x_q = xq_ref[...]
    q_mask = qmask_ref[...]
    if n_in >= 8:
        # TODO(synk): default-precision MXU matmul here (quantized values near a
        # level boundary could differ from an f32 reference by one level).
        vec = jnp.dot(x_q, q_mask, preferred_element_type=jnp.float32)
    else:
        # Tiny n_in: sum of rank-1 outer products on the VPU (exact f32).
        vec = x_q[:, 0:1] * q_mask[0:1, :]
        for k in range(1, n_in):
            vec = vec + x_q[:, k:k + 1] * q_mask[k:k + 1, :]
    vec = _q02(vec)
    out_ref[...] = _q02(vec + prev_ref[...])


# ---------------------------------------------------------------------------
# Wrapper
# ---------------------------------------------------------------------------

def _cdiv(a, b):
    return -(-a // b)


def _round_up(a, b):
    return ((a + b - 1) // b) * b


def _pick_tiles(rows, max_tile_rows):
    """Row-tile size (multiple of 8) and grid size.

    Uses >= 2 tiles whenever there are >= 2 sublane groups so the 'parallel'
    grid axis can cover both TensorCores on v7x; otherwise one masked tile.
    """
    rows8 = _round_up(max(rows, 1), 8)
    cap = max(8, _round_up(max_tile_rows, 8))
    want = max(_cdiv(rows8, cap), 2 if rows8 >= 16 else 1)
    tr = _round_up(_cdiv(rows8, want), 8)
    return tr, _cdiv(rows, tr)


def aq_ref_dfr_cell(x, prev_output, mask, *, max_tile_rows=4096):
    """x: (..., n_in), prev_output: (..., H), mask: (n_in, H) -> (..., H)."""
    n_in, h = mask.shape
    lead = x.shape[:-1]
    assert x.shape == lead + (n_in,), (x.shape, mask.shape)
    assert prev_output.shape == lead + (h,), (prev_output.shape, mask.shape)

    r = int(math.prod(lead)) if lead else 1
    x2 = jnp.asarray(x, jnp.float32).reshape(r, n_in)
    prev2 = jnp.asarray(prev_output, jnp.float32).reshape(r, h)
    mask_f = jnp.asarray(mask, jnp.float32)
    q_mask = _quantize(mask_f, _W_LO, _W_HI)          # hoisted: quantize once

    compiler_params = pltpu.CompilerParams(dimension_semantics=("parallel",))

    # Lane-dense layout: fold consecutive rows into the 128-wide lane axis.
    fold = 128 // h if (n_in == 1 and h <= 128 and 128 % h == 0) else 1

    if fold > 1:
        lanes = fold * h                               # == 128
        r_pad = _round_up(r, fold)
        if r_pad != r:                                 # rare; common case is copy-free
            x2 = jnp.pad(x2, ((0, r_pad - r), (0, 0)))
            prev2 = jnp.pad(prev2, ((0, r_pad - r), (0, 0)))
        rk = r_pad // fold

        # Exact integer codes for x (tiny stream; hoists the x quantize).
        codes = _quantize_codes(x2, _IN_LO, _IN_HI, _IN_INV).reshape(rk, fold)
        kdim = _round_up(fold, 8)
        if kdim != fold:
            codes = jnp.pad(codes, ((0, 0), (0, kdim - fold)))

        prevk = prev2.reshape(rk, lanes)               # free reshape (contiguous)
        # 0/1 selector: sel[g, l] = 1 iff lane l belongs to fold-group g.
        sel = (jnp.arange(lanes, dtype=jnp.int32)[None, :] // h ==
               jnp.arange(kdim, dtype=jnp.int32)[:, None]).astype(jnp.float32)
        qmask_k = jnp.tile(q_mask, (1, fold))          # (1, lanes), hoisted

        tr, num_tiles = _pick_tiles(rk, max_tile_rows)

        outk = pl.pallas_call(
            _dfr_fold_kernel,
            out_shape=jax.ShapeDtypeStruct((rk, lanes), jnp.float32),
            grid=(num_tiles,),
            in_specs=[
                pl.BlockSpec((tr, kdim), lambda i: (i, 0)),
                pl.BlockSpec((kdim, lanes), lambda i: (0, 0)),   # resident
                pl.BlockSpec((1, lanes), lambda i: (0, 0)),      # resident
                pl.BlockSpec((tr, lanes), lambda i: (i, 0)),
            ],
            out_specs=pl.BlockSpec((tr, lanes), lambda i: (i, 0)),
            compiler_params=compiler_params,
        )(codes, sel, qmask_k, prevk)

        out2 = outk.reshape(r_pad, h)
        if r_pad != r:
            out2 = out2[:r]
        return out2.reshape(lead + (h,))

    # ---------------- general fallback path (fold == 1) ----------------
    # Hoisted x quantization (same fp op sequence as the reference).
    xq = _quantize_codes(x2, _IN_LO, _IN_HI, _IN_INV) * _IN_SCALE + _IN_LO
    tr, num_tiles = _pick_tiles(r, max_tile_rows)
    kernel = functools.partial(_dfr_general_kernel, n_in=n_in)
    out2 = pl.pallas_call(
        kernel,
        out_shape=jax.ShapeDtypeStruct((r, h), jnp.float32),
        grid=(num_tiles,),
        in_specs=[
            pl.BlockSpec((tr, n_in), lambda i: (i, 0)),
            pl.BlockSpec((n_in, h), lambda i: (0, 0)),           # resident
            pl.BlockSpec((tr, h), lambda i: (i, 0)),
        ],
        out_specs=pl.BlockSpec((tr, h), lambda i: (i, 0)),
        compiler_params=compiler_params,
    )(xq, q_mask, prev2)
    return out2.reshape(lead + (h,))


# ---------------------------------------------------------------------------
# Pure-JAX reference (mirrors the PyTorch forward)
# ---------------------------------------------------------------------------

def reference(x, prev_output, mask):
    x_q = _quantize(x, _IN_LO, _IN_HI)
    q_mask = _quantize(mask, _W_LO, _W_HI)
    vec_x = jnp.matmul(x_q, q_mask, precision=jax.lax.Precision.HIGHEST)
    vec_x = jnp.clip(vec_x, _L1_LO, _L1_HI)           # act1
    vec_x_q = _q02(vec_x)                              # Quantize(vec_x, 0, 2)
    out = jnp.clip(vec_x_q + prev_output, _L1_LO, _L1_HI)   # act1
    return _q02(out)                                   # Quantize(output, 0, 2)


if __name__ == "__main__":
    key = jax.random.PRNGKey(0)
    k1, k2, k3 = jax.random.split(key, 3)

    B, T, N_IN, H = 2, 8, 1, 32     # n_in = 1, n_hidden = 32

    # nn.init.xavier_uniform_ on (n_in, n_hidden): U(-b, b), b = sqrt(6/(n_in+H))
    bound = math.sqrt(6.0 / (N_IN + H))
    mask = jax.random.uniform(k1, (N_IN, H), minval=-bound, maxval=bound,
                              dtype=jnp.float32)
    x = jax.random.normal(k2, (B, T, N_IN), dtype=jnp.float32)
    prev_output = jax.random.uniform(k3, (B, T, H), minval=0.0, maxval=2.0,
                                     dtype=jnp.float32)

    ref = reference(x, prev_output, mask)

    out = aq_ref_dfr_cell(x, prev_output, mask)
    out = jax.block_until_ready(out)

    assert out.shape == (B, T, H)
    assert jnp.allclose(out, ref, atol=1e-5, rtol=1e-5), (
        float(jnp.max(jnp.abs(out - ref))))

    print("KERNEL_OK")
</pallas_src>

<mosaic_0001>
module attributes {stable_mosaic.version = 11 : i64} {
  func.func @_dfr_fold_kernel(%arg0: i32, %arg1: memref<8x8xf32, #tpu.memory_space<vmem>>, %arg2: memref<8x128xf32, #tpu.memory_space<vmem>>, %arg3: memref<1x128xf32, #tpu.memory_space<vmem>>, %arg4: memref<8x128xf32, #tpu.memory_space<vmem>>, %arg5: memref<8x128xf32, #tpu.memory_space<vmem>>) attributes {dimension_semantics = [#tpu.dimension_semantics<parallel>], iteration_bounds = array<i64: 1>, scalar_prefetch = 0 : i64, scratch_operands = 0 : i64, tpu.core_type = #tpu.core_type<tc>, window_params = [{transform_indices = @transform_0, window_bounds = array<i64: 8, 8>}, {pipeline_mode = #tpu.pipeline_mode<synchronous>, transform_indices = @transform_1, window_bounds = array<i64: 8, 128>}, {pipeline_mode = #tpu.pipeline_mode<synchronous>, transform_indices = @transform_2, window_bounds = array<i64: 1, 128>}, {transform_indices = @transform_3, window_bounds = array<i64: 8, 128>}, {transform_indices = @transform_4, window_bounds = array<i64: 8, 128>}]} {
    %c0 = arith.constant 0 : index
    %c0_0 = arith.constant 0 : index
    %0 = vector.load %arg1[%c0, %c0_0] : memref<8x8xf32, #tpu.memory_space<vmem>>, vector<8x8xf32>
    %c0_1 = arith.constant 0 : index
    %c0_2 = arith.constant 0 : index
    %1 = vector.load %arg2[%c0_1, %c0_2] : memref<8x128xf32, #tpu.memory_space<vmem>>, vector<8x128xf32>
    %cst = arith.constant dense<0.000000e+00> : vector<8x128xf32>
    %2 = tpu.matmul %0, %1, %cst {dimension_numbers = #tpu.dot_dimension_numbers<[1], [0], [0], [1], [0, 0, 1, 1], [], []>} : vector<8x8xf32>, vector<8x128xf32>, vector<8x128xf32> -> vector<8x128xf32>
    %cst_3 = arith.constant 0.0196078438 : f32
    %3 = vector.broadcast %cst_3 : f32 to vector<8x128xf32>
    %4 = arith.mulf %2, %3 : vector<8x128xf32>
    %cst_4 = arith.constant -2.500000e+00 : f32
    %5 = vector.broadcast %cst_4 : f32 to vector<8x128xf32>
    %6 = arith.addf %4, %5 : vector<8x128xf32>
    %c0_5 = arith.constant 0 : index
    %c0_6 = arith.constant 0 : index
    %7 = vector.load %arg3[%c0_5, %c0_6] : memref<1x128xf32, #tpu.memory_space<vmem>>, vector<1x128xf32>
    %8 = vector.broadcast %7 : vector<1x128xf32> to vector<8x128xf32>
    %9 = arith.mulf %6, %8 : vector<8x128xf32>
    %cst_7 = arith.constant 0.000000e+00 : f32
    %cst_8 = arith.constant 2.000000e+00 : f32
    %10 = vector.broadcast %cst_7 : f32 to vector<8x128xf32>
    %11 = arith.maximumf %10, %9 : vector<8x128xf32>
    %12 = vector.broadcast %cst_8 : f32 to vector<8x128xf32>
    %13 = arith.minimumf %12, %11 : vector<8x128xf32>
    %cst_9 = arith.constant 1.275000e+02 : f32
    %14 = vector.broadcast %cst_9 : f32 to vector<8x128xf32>
    %15 = arith.mulf %13, %14 : vector<8x128xf32>
    %16 = math.roundeven %15 : vector<8x128xf32>
    %cst_10 = arith.constant 0.00784313772 : f32
    %17 = vector.broadcast %cst_10 : f32 to vector<8x128xf32>
    %18 = arith.mulf %16, %17 : vector<8x128xf32>
    %c0_11 = arith.constant 0 : index
    %c0_12 = arith.constant 0 : index
    %19 = vector.load %arg4[%c0_11, %c0_12] : memref<8x128xf32, #tpu.memory_space<vmem>>, vector<8x128xf32>
    %20 = arith.addf %18, %19 : vector<8x128xf32>
    %cst_13 = arith.constant 0.000000e+00 : f32
    %cst_14 = arith.constant 2.000000e+00 : f32
    %21 = vector.broadcast %cst_13 : f32 to vector<8x128xf32>
    %22 = arith.maximumf %21, %20 : vector<8x128xf32>
    %23 = vector.broadcast %cst_14 : f32 to vector<8x128xf32>
    %24 = arith.minimumf %23, %22 : vector<8x128xf32>
    %cst_15 = arith.constant 1.275000e+02 : f32
    %25 = vector.broadcast %cst_15 : f32 to vector<8x128xf32>
    %26 = arith.mulf %24, %25 : vector<8x128xf32>
    %27 = math.roundeven %26 : vector<8x128xf32>
    %cst_16 = arith.constant 0.00784313772 : f32
    %28 = vector.broadcast %cst_16 : f32 to vector<8x128xf32>
    %29 = arith.mulf %27, %28 : vector<8x128xf32>
    %c0_17 = arith.constant 0 : index
    %c0_18 = arith.constant 0 : index
    %30 = vector.load %arg5[%c0_17, %c0_18] : memref<8x128xf32, #tpu.memory_space<vmem>>, vector<8x128xf32>
    tpu.vector_store %arg5[%c0_17, %c0_18], %29 {strides = array<i32>} : memref<8x128xf32, #tpu.memory_space<vmem>>, vector<8x128xf32>,
    return
  }
  func.func @transform_0(%arg0: i32) -> (i32, i32) {
    %c0_i32 = arith.constant 0 : i32
    %c0_i32_0 = arith.constant 0 : i32
    return %arg0, %c0_i32 : i32, i32
  }
  func.func @transform_1(%arg0: i32) -> (i32, i32) {
    %c0_i32 = arith.constant 0 : i32
    %c0_i32_0 = arith.constant 0 : i32
    %c0_i32_1 = arith.constant 0 : i32
    return %c0_i32, %c0_i32_0 : i32, i32
  }
  func.func @transform_2(%arg0: i32) -> (i32, i32) {
    %c0_i32 = arith.constant 0 : i32
    %c0_i32_0 = arith.constant 0 : i32
    %c0_i32_1 = arith.constant 0 : i32
    return %c0_i32, %c0_i32_0 : i32, i32
  }
  func.func @transform_3(%arg0: i32) -> (i32, i32) {
    %c0_i32 = arith.constant 0 : i32
    %c0_i32_0 = arith.constant 0 : i32
    return %arg0, %c0_i32 : i32, i32
  }
  func.func @transform_4(%arg0: i32) -> (i32, i32) {
    %c0_i32 = arith.constant 0 : i32
    %c0_i32_0 = arith.constant 0 : i32
    return %arg0, %c0_i32 : i32, i32
  }
}

</mosaic_0001>

<bundles_post_ra>
// kernel: tpu_custom_call.1
= control target key start
LH: loop header
LB: loop body
LE: loop exit
PB: predicated region body
PF: predicated region fallthrough
CT: control target
= control target key end

     0   :  { %9 = vsyncpa [#allocation3], 0  ;;  %s310_s0 = inlined_call_operand.hbm [shape: f32[4,8], index: 0, kind: input, shape index: {}]   ;;  %s311_s1 = inlined_call_operand.hbm [shape: f32[8,128], index: 1, kind: input, shape index: {}]   ;;  %s312_s2 = inlined_call_operand.vmem [shape: f32[1,128], index: 2, kind: input, shape index: {}]   ;;  %s313_s3 = inlined_call_operand.hbm [shape: f32[4,128], index: 3, kind: input, shape index: {}]   ;;  %s314_s4 = inlined_call_operand.hbm [shape: f32[4,128], index: 4, kind: output, shape index: {}]  }
   0x1   :  { %10 = vsyncpa [#allocation6], 0 }
   0x2   :  { %11 = vsyncpa [#allocation4], 0 }
   0x3   :  { %15 = vsyncadd [#allocation3], 64  ;;  %s16_s17 = sshll.u32 %s310_s0, 4  ;;  %s255_s18 = smov [#allocation2]   ;;  %s17_s17 = int_to_ptr.hbm [resolvable:$true] %s16_s17 }
   0x4   :  { %s18_s19 = sshll.u32 %s255_s18, 4  ;;  %s30_s22 = sshll.u32 %s311_s1, 4  ;;  %s19_s19 = int_to_ptr.vmem [resolvable:$true] %s18_s19  ;;  %s31_s22 = int_to_ptr.hbm [resolvable:$true] %s30_s22 }
   0x5   :  { %s256_s23 = smov 64   ;;  %s257_s24 = smov 4  }
   0x6   :  { %24 = dma.hbm_to_vmem [thread:$0]  %s17_s17, 64, %s19_s19, [#allocation3], %s256_s23, %s256_s23, %s257_s24  }
   0x7   :  { %s258_s25 = smov [#allocation5]  }
   0x8   :  { %s32_s26 = sshll.u32 %s258_s25, 4  ;;  %s33_s26 = int_to_ptr.vmem [resolvable:$true] %s32_s26 }
   0x9   :  { %35 = dma.hbm_to_vmem [thread:$0]  %s31_s22, 128, %s33_s26, [#allocation6]  }
   0xa   :  { %41 = vsyncadd [#allocation6], 64  ;;  %s42_s28 = sshll.u32 %s313_s3, 4  ;;  %s259_s29 = smov [#allocation7]   ;;  %s43_s28 = int_to_ptr.hbm [resolvable:$true] %s42_s28 }
   0xb   :  { %s44_s30 = sshll.u32 %s259_s29, 4  ;;  %s45_s30 = int_to_ptr.vmem [resolvable:$true] %s44_s30 }
   0xc   :  { %50 = dma.hbm_to_vmem [thread:$0]  %s43_s28, 64, %s45_s30, [#allocation6], %s256_s23, %s256_s23, %s257_s24  }
   0xd   :  { %249 = dma.done.wait [#allocation3], 128  }
   0xe   :  { %250 = vsyncadd [#allocation3], 4294967168 }
   0xf   :  { %251 = dma.done.wait [#allocation6], 256  }
  0x10   :  { %252 = vsyncadd [#allocation6], 4294967040  ;;  %vm65_vm0 = vcmask 64512   ;;  %v64_v0 = vld [vmem:[#allocation5] sm:$0xff]  ;;  %v63_v1 = vld [vmem:[#allocation2] sm:$0xff] }
  0x11   :  { %84 = vmatpush.msra.mxu0 %v64_v0  ;;  %v152_v4 = vld [vmem:[%s312_s2] ss:$0 sm:$0xff]  ;;  %v101_v17 = vld [vmem:[#allocation7] sm:$0xff] }
  0x12   :  { %129 = vmatmul.msk.f32.vlgmr.msra.gmra.mxu0 %vm65_vm0, %v63_v1 }
  0x8f   :  { %v86_v2 = vpop.f32.mrf.mxu0 }
  0x90   :  { %v89_v3 = vmul.f32 0.019607844, %v86_v2 }
  0x92   :  { %v90_v5 = vadd.f32 -2.5, %v89_v3 }
  0x94   :  { %v95_v6 = vmul.f32 %v152_v4, %v90_v5 }
  0x96   :  { %v96_v7 = vmax.f32 %v95_v6, 0.0 }
  0x98   :  { %v97_v8 = vmin.f32 %v96_v7, 2.0 }
  0x9a   :  { %v98_v9 = vmul.f32 127.5, %v97_v8 }
  0x9c   :  { %v132_v10 = vcvt.f32.s32 %v98_v9  ;;  %v130_v12 = vand.u32 2147483647, %v98_v9  ;;  %v135_v14 = vand.u32 2147483648, %v98_v9 }
  0x9e   :  { %v133_v11 = vcvt.s32.f32 %v132_v10  ;;  %vm131_vm1 = vcmp.lt.f32.partialorder %v130_v12, 8388608.0 }
  0xa0   :  { %v134_v13 = vand.u32 2147483647, %v133_v11 }
  0xa2   :  { %v136_v15 = vor.u32 %v135_v14, %v134_v13 }
  0xa4   :  { %v137_v16 = vsel %vm131_vm1, %v136_v15, %v98_v9 }
  0xa5   :  { %v100_v18 = vmul.f32 0.007843138, %v137_v16 }
  0xa7   :  { %v102_v19 = vadd.f32 %v101_v17, %v100_v18 }
  0xa9   :  { %v103_v20 = vmax.f32 %v102_v19, 0.0 }
  0xab   :  { %v104_v21 = vmin.f32 %v103_v20, 2.0 }
  0xad   :  { %v105_v22 = vmul.f32 127.5, %v104_v21 }
  0xaf   :  { %v140_v23 = vcvt.f32.s32 %v105_v22  ;;  %v138_v25 = vand.u32 2147483647, %v105_v22  ;;  %v143_v27 = vand.u32 2147483648, %v105_v22 }
  0xb1   :  { %v141_v24 = vcvt.s32.f32 %v140_v23  ;;  %vm139_vm2 = vcmp.lt.f32.partialorder %v138_v25, 8388608.0 }
  0xb3   :  { %v142_v26 = vand.u32 2147483647, %v141_v24 }
  0xb5   :  { %v144_v28 = vor.u32 %v143_v27, %v142_v26 }
  0xb7   :  { %v145_v29 = vsel %vm139_vm2, %v144_v28, %v105_v22 }
  0xb8   :  { %v107_v30 = vmul.f32 0.007843138, %v145_v29 }
  0xba   :  { %108 = vst [vmem:[#allocation8] sm:$0xff] %v107_v30 }
  0xbb   :  { %112 = vsyncadd [#allocation4], 64  ;;  %s115_s6 = sshll.u32 %s314_s4, 4  ;;  %s260_s7 = smov [#allocation8]   ;;  %s116_s6 = int_to_ptr.hbm [resolvable:$true] %s115_s6 }
  0xbc   :  { %s113_s8 = sshll.u32 %s260_s7, 4  ;;  %s114_s8 = int_to_ptr.vmem [resolvable:$true] %s113_s8 }
  0xbd   :  { %121 = dma.vmem_to_hbm [thread:$0]  %s114_s8, 64, %s116_s6, [#allocation4], %s256_s23, %s256_s23, %s257_s24  }
  0xbe   :  { %253 = dma.done.wait [#allocation4], 128  }
  0xbf   :  { %254 = vsyncadd [#allocation4], 4294967168 }
  0xc0   :  { %126 = vsyncpa [#allocation3], 1 }
  0xc1   :  { %127 = vsyncpa [#allocation6], 1 }
  0xc2   :  { %128 = vsyncpa [#allocation4], 1 }

</bundles_post_ra>
